<compile_context>
chip_gen: v5e
topology: v5e:2x2
jax: 0.10.0
libtpu: 0.0.40
codegen_flags: <defaults>
</compile_context>

<pallas_src>
import jax
import jax.numpy as jnp
from jax.experimental import pallas as pl
from jax.experimental.pallas import tpu as pltpu


def _round_up(x, m):
    return (x + m - 1) // m * m


def patch_embed_kernel(p_ref, w_ref, b_ref, o_ref):
    # (tm, Kp) @ (Kp, E) on the MXU with f32 accumulation, + bias broadcast.
    acc = jnp.dot(p_ref[...], w_ref[...], preferred_element_type=jnp.float32)
    o_ref[...] = (acc + b_ref[...]).astype(o_ref.dtype)


def _pick_tm(M, Kp, N, in_bytes, out_bytes, budget_bytes):
    """Largest M-tile whose pipelined VMEM footprint fits the budget."""
    m_cap = max(_round_up(M, 16), 16)
    for tm in (2048, 1024, 512, 256, 128, 64, 32, 16):
        if tm > m_cap:
            continue
        footprint = (
            2 * tm * Kp * in_bytes      # double-buffered patch tile
            + 1 * Kp * N * in_bytes     # weight, single-buffered (Buffered(1))
            + 8 * N * 4                 # bias (sublane-padded), single-buffered
            + 2 * tm * N * out_bytes    # double-buffered output tile
        )
        if footprint <= budget_bytes:
            return tm
    return 16


def patch_embed(x, weight, bias, patch_size, *,
                compute_dtype=jnp.bfloat16, out_dtype=None,
                vmem_budget_bytes=20 * 1024 * 1024,
                vmem_limit_bytes=32 * 1024 * 1024):
    """x: (B, C, H, W) NCHW.  weight: (E, C, ph, pw).  bias: (E,).
    Returns (B, num_patches, E), matching proj(x).flatten(2).transpose(1, 2)."""
    B, C, H, W = x.shape
    ph, pw = patch_size
    E = weight.shape[0]
    assert H % ph == 0 and W % pw == 0
    gh, gw = H // ph, W // pw

    M = B * gh * gw            # total patches
    K = C * ph * pw            # flattened patch length, (c, i, j) order
    N = E                      # embedding dim (never tiled, never padded)

    in_dtype = compute_dtype if compute_dtype is not None else x.dtype
    if out_dtype is None:
        out_dtype = in_dtype
    in_bytes = jnp.dtype(in_dtype).itemsize
    out_bytes = jnp.dtype(out_dtype).itemsize

    # Lane-dense K; M padded only on the *input* side up to the M tile.
    Kp = _round_up(K, 128)
    tm = _pick_tm(M, Kp, N, in_bytes, out_bytes, vmem_budget_bytes)
    Mp = _round_up(M, tm)
    num_m = Mp // tm

    # ---- im2col (XLA may fuse it into the pallas input DMA) ----------------
    # Cast first so any materialized intermediate is already the compute dtype,
    # then flatten each patch in (c, ph, pw) order to match Conv2d weights.
    xc = x.astype(in_dtype)
    patches = (
        xc.reshape(B, C, gh, ph, gw, pw)
          .transpose(0, 2, 4, 1, 3, 5)          # (B, gh, gw, C, ph, pw)
          .reshape(M, K)
    )
    patches = jnp.pad(patches, ((0, Mp - M), (0, Kp - K)))

    wmat = jnp.pad(weight.reshape(E, K).astype(in_dtype),
                   ((0, 0), (0, Kp - K))).T      # (Kp, E)
    bvec = bias.reshape(1, N).astype(jnp.float32)

    bytes_accessed = (
        patches.size * in_bytes + wmat.size * in_bytes + N * 4 + M * N * out_bytes
    )

    out = pl.pallas_call(
        patch_embed_kernel,
        out_shape=jax.ShapeDtypeStruct((M, N), out_dtype),   # exact size: no slice copy
        grid=(num_m,),
        in_specs=[
            # streaming patch tile: changes every grid step
            pl.BlockSpec((tm, Kp), lambda i: (i, 0)),
            # resident weight: block index constant -> single buffer is enough
            pl.BlockSpec((Kp, N), lambda i: (0, 0), pipeline_mode=pl.Buffered(1)),
            # resident bias
            pl.BlockSpec((1, N), lambda i: (0, 0), pipeline_mode=pl.Buffered(1)),
        ],
        out_specs=pl.BlockSpec((tm, N), lambda i: (i, 0)),
        compiler_params=pltpu.CompilerParams(
            dimension_semantics=("parallel",),     # many M tiles -> megacore shards M
            allow_input_fusion=[True, True, True],
            vmem_limit_bytes=vmem_limit_bytes,
        ),
        cost_estimate=pl.CostEstimate(
            flops=2 * Mp * Kp * N,
            transcendentals=0,
            bytes_accessed=int(bytes_accessed),
        ),
    )(patches, wmat, bvec)

    return out.reshape(B, gh * gw, N)             # contiguous reshape, free


if __name__ == "__main__":
    # Small shapes consistent with PatchEmbed(img_size=16, patch_size=4,
    # in_chans=4, embed_dim=32), batch=2.
    C, H, W = 4, 16, 16
    ph = pw = 4
    E = 32
    gh, gw = H // ph, W // pw

    key = jax.random.PRNGKey(0)
    kx, kw, kb = jax.random.split(key, 3)

    weight = 0.05 * jax.random.normal(kw, (E, C, ph, pw), dtype=jnp.float32)
    bias = 0.01 * jax.random.normal(kb, (E,), dtype=jnp.float32)

    def reference(x):
        b = x.shape[0]
        p = (x.reshape(b, C, gh, ph, gw, pw)
               .transpose(0, 2, 4, 1, 3, 5)
               .reshape(b, gh * gw, C * ph * pw))
        return jnp.einsum("bpk,ek->bpe", p, weight.reshape(E, -1)) + bias

    # 1) Default fast path: bf16 operands + bf16 output, f32 accumulation.
    x = jax.random.normal(kx, (2, C, H, W), dtype=jnp.float32)
    ref = reference(x)
    out_bf16 = jax.block_until_ready(patch_embed(x, weight, bias, (ph, pw)))
    assert out_bf16.shape == (2, gh * gw, E)
    assert out_bf16.dtype == jnp.bfloat16
    assert jnp.allclose(out_bf16.astype(jnp.float32), ref, atol=5e-2, rtol=5e-2)

    # 2) Full-precision path (same kernel, f32 in/out): tight numerical check.
    out_f32 = jax.block_until_ready(
        patch_embed(x, weight, bias, (ph, pw),
                    compute_dtype=None, out_dtype=jnp.float32))
    assert out_f32.dtype == jnp.float32
    assert jnp.allclose(out_f32, ref, atol=1e-4, rtol=1e-4)

    # 3) Ragged final M block (B=3 -> M=48, tm=32 -> masked stores on the last
    #    output tile): exercises the no-slice output path.
    x3 = jax.random.normal(kx, (3, C, H, W), dtype=jnp.float32)
    out3 = jax.block_until_ready(
        patch_embed(x3, weight, bias, (ph, pw),
                    compute_dtype=None, out_dtype=jnp.float32))
    assert out3.shape == (3, gh * gw, E)
    assert jnp.allclose(out3, reference(x3), atol=1e-4, rtol=1e-4)

    print("KERNEL_OK")
</pallas_src>

<mosaic_0001>
module attributes {stable_mosaic.version = 11 : i64} {
  func.func @patch_embed_kernel(%arg0: i32, %arg1: memref<32x128xbf16, #tpu.memory_space<vmem>>, %arg2: memref<128x32xbf16, #tpu.memory_space<vmem>>, %arg3: memref<1x32xf32, #tpu.memory_space<vmem>>, %arg4: memref<32x32xbf16, #tpu.memory_space<vmem>>) attributes {dimension_semantics = [#tpu.dimension_semantics<parallel>], iteration_bounds = array<i64: 1>, scalar_prefetch = 0 : i64, scratch_operands = 0 : i64, tpu.core_type = #tpu.core_type<tc>, window_params = [{transform_indices = @transform_0, window_bounds = array<i64: 32, 128>}, {pipeline_mode = #tpu.pipeline_mode<synchronous>, transform_indices = @transform_1, window_bounds = array<i64: 128, 32>}, {pipeline_mode = #tpu.pipeline_mode<synchronous>, transform_indices = @transform_2, window_bounds = array<i64: 1, 32>}, {transform_indices = @transform_3, window_bounds = array<i64: 32, 32>}]} {
    %c0 = arith.constant 0 : index
    %c0_0 = arith.constant 0 : index
    %0 = vector.load %arg1[%c0, %c0_0] : memref<32x128xbf16, #tpu.memory_space<vmem>>, vector<32x128xbf16>
    %c0_1 = arith.constant 0 : index
    %c0_2 = arith.constant 0 : index
    %1 = vector.load %arg2[%c0_1, %c0_2] : memref<128x32xbf16, #tpu.memory_space<vmem>>, vector<128x32xbf16>
    %cst = arith.constant dense<0.000000e+00> : vector<32x32xf32>
    %2 = tpu.matmul %0, %1, %cst {dimension_numbers = #tpu.dot_dimension_numbers<[1], [0], [0], [1], [0, 0, 1, 1], [], []>} : vector<32x128xbf16>, vector<128x32xbf16>, vector<32x32xf32> -> vector<32x32xf32>
    %c0_3 = arith.constant 0 : index
    %c0_4 = arith.constant 0 : index
    %3 = vector.load %arg3[%c0_3, %c0_4] : memref<1x32xf32, #tpu.memory_space<vmem>>, vector<1x32xf32>
    %4 = vector.broadcast %3 : vector<1x32xf32> to vector<32x32xf32>
    %5 = arith.addf %2, %4 : vector<32x32xf32>
    %6 = arith.truncf %5 : vector<32x32xf32> to vector<32x32xbf16>
    %c0_5 = arith.constant 0 : index
    %c0_6 = arith.constant 0 : index
    %7 = vector.load %arg4[%c0_5, %c0_6] : memref<32x32xbf16, #tpu.memory_space<vmem>>, vector<32x32xbf16>
    tpu.vector_store %arg4[%c0_5, %c0_6], %6 {strides = array<i32>} : memref<32x32xbf16, #tpu.memory_space<vmem>>, vector<32x32xbf16>,
    return
  }
  func.func @transform_0(%arg0: i32) -> (i32, i32) {
    %c0_i32 = arith.constant 0 : i32
    %c0_i32_0 = arith.constant 0 : i32
    return %arg0, %c0_i32 : i32, i32
  }
  func.func @transform_1(%arg0: i32) -> (i32, i32) {
    %c0_i32 = arith.constant 0 : i32
    %c0_i32_0 = arith.constant 0 : i32
    %c0_i32_1 = arith.constant 0 : i32
    return %c0_i32, %c0_i32_0 : i32, i32
  }
  func.func @transform_2(%arg0: i32) -> (i32, i32) {
    %c0_i32 = arith.constant 0 : i32
    %c0_i32_0 = arith.constant 0 : i32
    %c0_i32_1 = arith.constant 0 : i32
    return %c0_i32, %c0_i32_0 : i32, i32
  }
  func.func @transform_3(%arg0: i32) -> (i32, i32) {
    %c0_i32 = arith.constant 0 : i32
    %c0_i32_0 = arith.constant 0 : i32
    return %arg0, %c0_i32 : i32, i32
  }
}

</mosaic_0001>

<bundles_post_ra>
// kernel: tpu_custom_call.1
= control target key start
LH: loop header
LB: loop body
LE: loop exit
PB: predicated region body
PF: predicated region fallthrough
CT: control target
= control target key end

     0   :  { %s296_s0 = inlined_call_operand.vmem [shape: bf16[32,128], index: 0, kind: input, shape index: {}]   ;;  %s297_s1 = inlined_call_operand.vmem [shape: bf16[128,32], index: 1, kind: input, shape index: {}]   ;;  %s298_s2 = inlined_call_operand.vmem [shape: f32[1,32], index: 2, kind: input, shape index: {}]   ;;  %s299_s3 = inlined_call_operand.hbm [shape: bf16[32,32], index: 3, kind: output, shape index: {}]  }
   0x1   :  { %v194_v0 = vld [vmem:[%s297_s1 + $0x38] sm:$0xff]  ;;  %v193_v1 = vld [vmem:[%s297_s1 + $0x30] sm:$0xff] }
   0x2   :  { %99 = vmatpush.bf16.msra.mxu0 %v194_v0  ;;  %195 = vmatpush.bf16.msra.mxu1 %v194_v0 }
   0x3   :  { %8 = vsyncpa [#allocation3], 0  ;;  %v192_v2 = vld [vmem:[%s297_s1 + $0x28] sm:$0xff]  ;;  %v191_v3 = vld [vmem:[%s297_s1 + $0x20] sm:$0xff]  ;;  %vm122_vm0 = vcmask 257024   ;;  %s133_s9 = sshll.u32 %s299_s3, 4  ;;  %s134_s9 = int_to_ptr.hbm [resolvable:$true] %s133_s9 }
   0x4   :  { %v190_v4 = vld [vmem:[%s297_s1 + $0x18] sm:$0xff]  ;;  %v189_v5 = vld [vmem:[%s297_s1 + $0x10] sm:$0xff]  ;;  %v188_v6 = vld [vmem:[%s297_s1 + $0x8] sm:$0xff]  ;;  %s235_s10 = smov 4  }
   0x5   :  { %v187_v7 = vld [vmem:[%s297_s1] sm:$0xff]  ;;  %v186_v9 = vld [vmem:[%s296_s0 + $0x8] sm:$0xff] }
   0x6   :  { %100 = vmatpush.bf16.msra.mxu0 %v193_v1  ;;  %196 = vmatpush.bf16.msra.mxu1 %v193_v1  ;;  %v185_v8 = vld [vmem:[%s296_s0] sm:$0xff]  ;;  %s233_s0 = smov [#allocation2]  }
   0x7   :  { %v206_v10 = vld [vmem:[%s298_s2] ss:$0 sm:$0xff]  ;;  %s131_s1 = sshll.u32 %s233_s0, 4  ;;  %s234_s2 = smov 64   ;;  %s132_s1 = int_to_ptr.vmem [resolvable:$true] %s131_s1 }
   0xa   :  { %101 = vmatpush.bf16.msra.mxu0 %v192_v2  ;;  %197 = vmatpush.bf16.msra.mxu1 %v192_v2 }
   0xe   :  { %102 = vmatpush.bf16.msra.mxu0 %v191_v3  ;;  %198 = vmatpush.bf16.msra.mxu1 %v191_v3 }
  0x12   :  { %103 = vmatpush.bf16.msra.mxu0 %v190_v4  ;;  %199 = vmatpush.bf16.msra.mxu1 %v190_v4 }
  0x16   :  { %104 = vmatpush.bf16.msra.mxu0 %v189_v5  ;;  %200 = vmatpush.bf16.msra.mxu1 %v189_v5 }
  0x1a   :  { %105 = vmatpush.bf16.msra.mxu0 %v188_v6  ;;  %201 = vmatpush.bf16.msra.mxu1 %v188_v6 }
  0x1e   :  { %106 = vmatpush.bf16.msra.mxu0 %v187_v7  ;;  %202 = vmatpush.bf16.msra.mxu1 %v187_v7 }
  0x21   :  { %107 = vmatmul.bf16.vlgmr.msra.gmra.mxu0 %v185_v8  ;;  %112 = vmatmul.bf16.vlgmr.msra.gmra.mxu1 %v186_v9 }
  0x9e   :  { %v108_v11 = vpop.f32.mrf.mxu0  ;;  %v113_v12 = vpop.f32.mrf.mxu1 }
  0x9f   :  { %v109_v13 = vadd.f32 %v206_v10, %v108_v11  ;;  %v114_v14 = vadd.f32 %v206_v10, %v113_v12 }
  0xa1   :  { %v118_v15 = vpack.c.bf16 %v109_v13, %v109_v13  ;;  %v120_v16 = vpack.c.bf16 %v114_v14, %v114_v14 }
  0xa3   :  { %123 = vst.msk [vmem:[#allocation2] sm:$0xf] %vm122_vm0, %v118_v15 }
  0xa4   :  { %125 = vst.msk [vmem:[#allocation2 + $0x8] sm:$0xf] %vm122_vm0, %v120_v16 }
  0xa6   :  { %v110_v17 = vpop.f32.mrf.mxu0  ;;  %v115_v18 = vpop.f32.mrf.mxu1 }
  0xa7   :  { %v111_v19 = vadd.f32 %v206_v10, %v110_v17  ;;  %v116_v20 = vadd.f32 %v206_v10, %v115_v18 }
  0xa9   :  { %v119_v21 = vpack.c.bf16 %v111_v19, %v111_v19  ;;  %v121_v22 = vpack.c.bf16 %v116_v20, %v116_v20 }
  0xab   :  { %124 = vst.msk [vmem:[#allocation2 + $0x4] sm:$0xf] %vm122_vm0, %v119_v21 }
  0xac   :  { %126 = vst.msk [vmem:[#allocation2 + $0xc] sm:$0xf] %vm122_vm0, %v121_v22 }
  0xad   :  { %139 = dma.vmem_to_hbm [thread:$0]  %s132_s1, 256, %s134_s9, [#allocation3], %s234_s2, %s234_s2, %s235_s10  }
  0xae   :  { %231 = dma.done.wait [#allocation3], 256  }
  0xaf   :  { %232 = vsyncadd [#allocation3], 4294967040 }
  0xb0   :  { %144 = vsyncpa [#allocation3], 1 }

</bundles_post_ra>
